<compile_context>
chip_gen: v5e
topology: v5e:2x2
jax: 0.10.0
libtpu: 0.0.40
codegen_flags: <defaults>
</compile_context>

<pallas_src>
import jax
import jax.numpy as jnp
from jax.experimental import pallas as pl
from jax.experimental.pallas import tpu as pltpu

HIDDEN = 128       # fixed by the module definition
LANE = 128         # TPU lane width
TM_MAX = 2048      # max rows of x per grid step (footprint < 3 MiB double-buffered)
MIN_TILES = 2      # give both v7x TensorCores work on mid/large batches


def _cdiv(a, b):
    return (a + b - 1) // b


def _round_up(x, m):
    return _cdiv(x, m) * m


def _tile_batch(batch):
    """Pick (tile_rows, padded_batch) so padding waste < 16 rows per tile."""
    b16 = _round_up(max(batch, 1), 16)
    n_tiles = _cdiv(b16, TM_MAX)
    # Ensure >= MIN_TILES tiles for batches big enough to split (>=128 rows/tile)
    # so a v7x "parallel" grid axis shards across both TensorCores.
    if n_tiles < MIN_TILES and b16 >= MIN_TILES * 128:
        n_tiles = MIN_TILES
    tm = _round_up(_cdiv(b16, n_tiles), 16)
    return tm, n_tiles * tm


def dqn_kernel(x_ref, w1_ref, b1_ref, w2_ref, b2_ref, w3_ref, b3_ref, o_ref):
    # Cast x to bf16 on the VPU (free in an HBM-bound kernel; keeps x HBM
    # traffic at 4 B/elem total instead of wrapper-cast 4+2+2).
    x = x_ref[...].astype(jnp.bfloat16)
    # Layer 1: Linear(input_dim, 128) + ReLU  (bf16 MXU operands, f32 acc)
    h1 = jnp.dot(x, w1_ref[...], preferred_element_type=jnp.float32)
    h1 = jnp.maximum(h1 + b1_ref[...], 0.0)
    # Layer 2: Linear(128, 128) + ReLU
    h2 = jnp.dot(h1.astype(jnp.bfloat16), w2_ref[...],
                 preferred_element_type=jnp.float32)
    h2 = jnp.maximum(h2 + b2_ref[...], 0.0)
    # Layer 3: Linear(128, out_pad)  (lane-padded output -> full 128-lane vst)
    out = jnp.dot(h2.astype(jnp.bfloat16), w3_ref[...],
                  preferred_element_type=jnp.float32)
    o_ref[...] = (out + b3_ref[...]).astype(o_ref.dtype)


def prepare_params(params, *, argmax_safe_pad=False):
    """One-time cast / lane-pad of the weights (do NOT call per forward step).

    If argmax_safe_pad, the padded b3 columns are -1e30 so the padded output
    can be consumed directly by an argmax over actions (no post-kernel slice).
    """
    output_dim = params["w3"].shape[1]
    out_pad = _round_up(max(output_dim, LANE), LANE)
    pad_cols = out_pad - output_dim
    w3 = jnp.pad(params["w3"], ((0, 0), (0, pad_cols)))
    b3 = jnp.pad(params["b3"], ((0, 0), (0, pad_cols)),
                 constant_values=(-1e30 if argmax_safe_pad else 0.0))
    return {
        "w1": params["w1"].astype(jnp.bfloat16),
        "b1": params["b1"].astype(jnp.float32),
        "w2": params["w2"].astype(jnp.bfloat16),
        "b2": params["b2"].astype(jnp.float32),
        "w3": w3.astype(jnp.bfloat16),
        "b3": b3.astype(jnp.float32),
        "output_dim": output_dim,
        "out_pad": out_pad,
    }


def dqn_forward(x, prep, *, out_dtype=jnp.float32, return_padded=False):
    """x: (batch, input_dim) float32; prep: output of prepare_params()."""
    batch, input_dim = x.shape
    output_dim = prep["output_dim"]
    out_pad = prep["out_pad"]

    tm, batch_pad = _tile_batch(batch)
    xp = x if batch_pad == batch else jnp.pad(x, ((0, batch_pad - batch), (0, 0)))
    xp = xp.astype(jnp.float32)          # no-op if already f32; cast to bf16 in-kernel

    grid = (batch_pad // tm,)
    out_bytes = jnp.dtype(out_dtype).itemsize

    flops = 2 * batch_pad * (input_dim * HIDDEN + HIDDEN * HIDDEN + HIDDEN * out_pad)
    bytes_accessed = (
        batch_pad * input_dim * 4                                          # x (f32)
        + batch_pad * out_pad * out_bytes                                  # output
        + (input_dim * HIDDEN + HIDDEN * HIDDEN + HIDDEN * out_pad) * 2    # weights bf16
        + (2 * HIDDEN + out_pad) * 4                                       # biases f32
    )

    out_padded = pl.pallas_call(
        dqn_kernel,
        out_shape=jax.ShapeDtypeStruct((batch_pad, out_pad), out_dtype),
        grid=grid,
        in_specs=[
            pl.BlockSpec((tm, input_dim), lambda i: (i, 0)),      # x tile (streamed)
            pl.BlockSpec((input_dim, HIDDEN), lambda i: (0, 0)),  # w1 (VMEM-resident)
            pl.BlockSpec((1, HIDDEN), lambda i: (0, 0)),          # b1
            pl.BlockSpec((HIDDEN, HIDDEN), lambda i: (0, 0)),     # w2
            pl.BlockSpec((1, HIDDEN), lambda i: (0, 0)),          # b2
            pl.BlockSpec((HIDDEN, out_pad), lambda i: (0, 0)),    # w3 (lane-padded)
            pl.BlockSpec((1, out_pad), lambda i: (0, 0)),         # b3 (lane-padded)
        ],
        out_specs=pl.BlockSpec((tm, out_pad), lambda i: (i, 0)),
        compiler_params=pltpu.CompilerParams(
            dimension_semantics=("parallel",),
        ),
        cost_estimate=pl.CostEstimate(
            flops=flops, transcendentals=0, bytes_accessed=bytes_accessed),
    )(xp, prep["w1"], prep["b1"], prep["w2"], prep["b2"], prep["w3"], prep["b3"])

    if return_padded:
        return out_padded                  # (batch_pad, 128): argmax-safe if padded b3
    return out_padded[:batch, :output_dim]


def init_params(key, input_dim, output_dim):
    """Deterministic init mimicking PyTorch Linear default (uniform +/- 1/sqrt(fan_in)).
    Weights stored as (in_features, out_features) so the kernel does x @ W + b."""
    k1, k2, k3, k4, k5, k6 = jax.random.split(key, 6)

    def lin(kw, kb, fan_in, fan_out):
        bound = 1.0 / jnp.sqrt(fan_in)
        w = jax.random.uniform(kw, (fan_in, fan_out), jnp.float32, -bound, bound)
        b = jax.random.uniform(kb, (1, fan_out), jnp.float32, -bound, bound)
        return w, b

    w1, b1 = lin(k1, k2, input_dim, HIDDEN)
    w2, b2 = lin(k3, k4, HIDDEN, HIDDEN)
    w3, b3 = lin(k5, k6, HIDDEN, output_dim)
    return {"w1": w1, "b1": b1, "w2": w2, "b2": b2, "w3": w3, "b3": b3}


def reference_forward_f32(x, params):
    h1 = jnp.maximum(x @ params["w1"] + params["b1"], 0.0)
    h2 = jnp.maximum(h1 @ params["w2"] + params["b2"], 0.0)
    return h2 @ params["w3"] + params["b3"]


def reference_forward_bf16(x, params):
    """Reference matching the kernel's numerics: bf16 MXU operands, f32 acc."""
    w1 = params["w1"].astype(jnp.bfloat16)
    w2 = params["w2"].astype(jnp.bfloat16)
    w3 = params["w3"].astype(jnp.bfloat16)
    h1 = jnp.dot(x.astype(jnp.bfloat16), w1, preferred_element_type=jnp.float32)
    h1 = jnp.maximum(h1 + params["b1"], 0.0)
    h2 = jnp.dot(h1.astype(jnp.bfloat16), w2, preferred_element_type=jnp.float32)
    h2 = jnp.maximum(h2 + params["b2"], 0.0)
    out = jnp.dot(h2.astype(jnp.bfloat16), w3, preferred_element_type=jnp.float32)
    return out + params["b3"]


if __name__ == "__main__":
    input_dim = 16
    output_dim = 8
    batch = 2

    key = jax.random.PRNGKey(0)
    kx, kp, kx2 = jax.random.split(key, 3)
    x = jax.random.normal(kx, (batch, input_dim), jnp.float32)
    raw_params = init_params(kp, input_dim, output_dim)
    prep = prepare_params(raw_params)      # one-time weight cast / pad

    out = jax.block_until_ready(dqn_forward(x, prep))
    assert out.shape == (batch, output_dim)
    assert out.dtype == jnp.float32

    # Tight check against a reference matching the kernel's bf16-MXU numerics.
    ref_bf16 = reference_forward_bf16(x, raw_params)
    assert jnp.allclose(out, ref_bf16, atol=1e-2, rtol=1e-2), "mismatch vs bf16 reference"
    # Loose check against the full-f32 PyTorch-equivalent forward.
    ref_f32 = reference_forward_f32(x, raw_params)
    assert jnp.allclose(out, ref_f32, atol=5e-2, rtol=5e-2), "mismatch vs f32 reference"

    # Larger, non-power-of-two batch: exercises the >=2-tile grid (no row
    # padding for 640 since tm=320 divides it) and the bf16-output path.
    x2 = jax.random.normal(kx2, (640, input_dim), jnp.float32)
    out2 = jax.block_until_ready(dqn_forward(x2, prep, out_dtype=jnp.bfloat16))
    ref2 = reference_forward_bf16(x2, raw_params)
    assert out2.shape == (640, output_dim)
    assert out2.dtype == jnp.bfloat16
    assert jnp.allclose(out2.astype(jnp.float32), ref2, atol=5e-2, rtol=5e-2), \
        "mismatch on tiled batch"

    print("KERNEL_OK")
</pallas_src>

<mosaic_0001>
module attributes {stable_mosaic.version = 11 : i64} {
  func.func @dqn_kernel(%arg0: i32, %arg1: memref<16x16xf32, #tpu.memory_space<vmem>>, %arg2: memref<16x128xbf16, #tpu.memory_space<vmem>>, %arg3: memref<1x128xf32, #tpu.memory_space<vmem>>, %arg4: memref<128x128xbf16, #tpu.memory_space<vmem>>, %arg5: memref<1x128xf32, #tpu.memory_space<vmem>>, %arg6: memref<128x128xbf16, #tpu.memory_space<vmem>>, %arg7: memref<1x128xf32, #tpu.memory_space<vmem>>, %arg8: memref<16x128xf32, #tpu.memory_space<vmem>>) attributes {dimension_semantics = [#tpu.dimension_semantics<parallel>], iteration_bounds = array<i64: 1>, scalar_prefetch = 0 : i64, scratch_operands = 0 : i64, tpu.core_type = #tpu.core_type<tc>, window_params = [{transform_indices = @transform_0, window_bounds = array<i64: 16, 16>}, {pipeline_mode = #tpu.pipeline_mode<synchronous>, transform_indices = @transform_1, window_bounds = array<i64: 16, 128>}, {pipeline_mode = #tpu.pipeline_mode<synchronous>, transform_indices = @transform_2, window_bounds = array<i64: 1, 128>}, {pipeline_mode = #tpu.pipeline_mode<synchronous>, transform_indices = @transform_3, window_bounds = array<i64: 128, 128>}, {pipeline_mode = #tpu.pipeline_mode<synchronous>, transform_indices = @transform_4, window_bounds = array<i64: 1, 128>}, {pipeline_mode = #tpu.pipeline_mode<synchronous>, transform_indices = @transform_5, window_bounds = array<i64: 128, 128>}, {pipeline_mode = #tpu.pipeline_mode<synchronous>, transform_indices = @transform_6, window_bounds = array<i64: 1, 128>}, {transform_indices = @transform_7, window_bounds = array<i64: 16, 128>}]} {
    %c0 = arith.constant 0 : index
    %c0_0 = arith.constant 0 : index
    %0 = vector.load %arg1[%c0, %c0_0] : memref<16x16xf32, #tpu.memory_space<vmem>>, vector<16x16xf32>
    %1 = arith.truncf %0 : vector<16x16xf32> to vector<16x16xbf16>
    %c0_1 = arith.constant 0 : index
    %c0_2 = arith.constant 0 : index
    %2 = vector.load %arg2[%c0_1, %c0_2] : memref<16x128xbf16, #tpu.memory_space<vmem>>, vector<16x128xbf16>
    %cst = arith.constant dense<0.000000e+00> : vector<16x128xf32>
    %3 = tpu.matmul %1, %2, %cst {dimension_numbers = #tpu.dot_dimension_numbers<[1], [0], [0], [1], [0, 0, 1, 1], [], []>} : vector<16x16xbf16>, vector<16x128xbf16>, vector<16x128xf32> -> vector<16x128xf32>
    %c0_3 = arith.constant 0 : index
    %c0_4 = arith.constant 0 : index
    %4 = vector.load %arg3[%c0_3, %c0_4] : memref<1x128xf32, #tpu.memory_space<vmem>>, vector<1x128xf32>
    %5 = vector.broadcast %4 : vector<1x128xf32> to vector<16x128xf32>
    %6 = arith.addf %3, %5 : vector<16x128xf32>
    %cst_5 = arith.constant 0.000000e+00 : f32
    %7 = vector.broadcast %cst_5 : f32 to vector<16x128xf32>
    %8 = arith.maximumf %6, %7 : vector<16x128xf32>
    %9 = arith.truncf %8 : vector<16x128xf32> to vector<16x128xbf16>
    %c0_6 = arith.constant 0 : index
    %c0_7 = arith.constant 0 : index
    %10 = vector.load %arg4[%c0_6, %c0_7] : memref<128x128xbf16, #tpu.memory_space<vmem>>, vector<128x128xbf16>
    %cst_8 = arith.constant dense<0.000000e+00> : vector<16x128xf32>
    %11 = tpu.matmul %9, %10, %cst_8 {dimension_numbers = #tpu.dot_dimension_numbers<[1], [0], [0], [1], [0, 0, 1, 1], [], []>} : vector<16x128xbf16>, vector<128x128xbf16>, vector<16x128xf32> -> vector<16x128xf32>
    %c0_9 = arith.constant 0 : index
    %c0_10 = arith.constant 0 : index
    %12 = vector.load %arg5[%c0_9, %c0_10] : memref<1x128xf32, #tpu.memory_space<vmem>>, vector<1x128xf32>
    %13 = vector.broadcast %12 : vector<1x128xf32> to vector<16x128xf32>
    %14 = arith.addf %11, %13 : vector<16x128xf32>
    %cst_11 = arith.constant 0.000000e+00 : f32
    %15 = vector.broadcast %cst_11 : f32 to vector<16x128xf32>
    %16 = arith.maximumf %14, %15 : vector<16x128xf32>
    %17 = arith.truncf %16 : vector<16x128xf32> to vector<16x128xbf16>
    %c0_12 = arith.constant 0 : index
    %c0_13 = arith.constant 0 : index
    %18 = vector.load %arg6[%c0_12, %c0_13] : memref<128x128xbf16, #tpu.memory_space<vmem>>, vector<128x128xbf16>
    %cst_14 = arith.constant dense<0.000000e+00> : vector<16x128xf32>
    %19 = tpu.matmul %17, %18, %cst_14 {dimension_numbers = #tpu.dot_dimension_numbers<[1], [0], [0], [1], [0, 0, 1, 1], [], []>} : vector<16x128xbf16>, vector<128x128xbf16>, vector<16x128xf32> -> vector<16x128xf32>
    %c0_15 = arith.constant 0 : index
    %c0_16 = arith.constant 0 : index
    %20 = vector.load %arg7[%c0_15, %c0_16] : memref<1x128xf32, #tpu.memory_space<vmem>>, vector<1x128xf32>
    %21 = vector.broadcast %20 : vector<1x128xf32> to vector<16x128xf32>
    %22 = arith.addf %19, %21 : vector<16x128xf32>
    %c0_17 = arith.constant 0 : index
    %c0_18 = arith.constant 0 : index
    %23 = vector.load %arg8[%c0_17, %c0_18] : memref<16x128xf32, #tpu.memory_space<vmem>>, vector<16x128xf32>
    tpu.vector_store %arg8[%c0_17, %c0_18], %22 {strides = array<i32>} : memref<16x128xf32, #tpu.memory_space<vmem>>, vector<16x128xf32>,
    return
  }
  func.func @transform_0(%arg0: i32) -> (i32, i32) {
    %c0_i32 = arith.constant 0 : i32
    %c0_i32_0 = arith.constant 0 : i32
    return %arg0, %c0_i32 : i32, i32
  }
  func.func @transform_1(%arg0: i32) -> (i32, i32) {
    %c0_i32 = arith.constant 0 : i32
    %c0_i32_0 = arith.constant 0 : i32
    %c0_i32_1 = arith.constant 0 : i32
    return %c0_i32, %c0_i32_0 : i32, i32
  }
  func.func @transform_2(%arg0: i32) -> (i32, i32) {
    %c0_i32 = arith.constant 0 : i32
    %c0_i32_0 = arith.constant 0 : i32
    %c0_i32_1 = arith.constant 0 : i32
    return %c0_i32, %c0_i32_0 : i32, i32
  }
  func.func @transform_3(%arg0: i32) -> (i32, i32) {
    %c0_i32 = arith.constant 0 : i32
    %c0_i32_0 = arith.constant 0 : i32
    %c0_i32_1 = arith.constant 0 : i32
    return %c0_i32, %c0_i32_0 : i32, i32
  }
  func.func @transform_4(%arg0: i32) -> (i32, i32) {
    %c0_i32 = arith.constant 0 : i32
    %c0_i32_0 = arith.constant 0 : i32
    %c0_i32_1 = arith.constant 0 : i32
    return %c0_i32, %c0_i32_0 : i32, i32
  }
  func.func @transform_5(%arg0: i32) -> (i32, i32) {
    %c0_i32 = arith.constant 0 : i32
    %c0_i32_0 = arith.constant 0 : i32
    %c0_i32_1 = arith.constant 0 : i32
    return %c0_i32, %c0_i32_0 : i32, i32
  }
  func.func @transform_6(%arg0: i32) -> (i32, i32) {
    %c0_i32 = arith.constant 0 : i32
    %c0_i32_0 = arith.constant 0 : i32
    %c0_i32_1 = arith.constant 0 : i32
    return %c0_i32, %c0_i32_0 : i32, i32
  }
  func.func @transform_7(%arg0: i32) -> (i32, i32) {
    %c0_i32 = arith.constant 0 : i32
    %c0_i32_0 = arith.constant 0 : i32
    return %arg0, %c0_i32 : i32, i32
  }
}

</mosaic_0001>

<bundles_post_ra>
// kernel: tpu_custom_call.1
= control target key start
LH: loop header
LB: loop body
LE: loop exit
PB: predicated region body
PF: predicated region fallthrough
CT: control target
= control target key end

     0   :  { %12 = vsyncpa [#allocation3], 0  ;;  %s622_s0 = inlined_call_operand.hbm [shape: f32[16,16], index: 0, kind: input, shape index: {}]   ;;  %s623_s1 = inlined_call_operand.hbm [shape: bf16[16,128], index: 1, kind: input, shape index: {}]   ;;  %s624_s2 = inlined_call_operand.vmem [shape: f32[1,128], index: 2, kind: input, shape index: {}]   ;;  %s625_s3 = inlined_call_operand.hbm [shape: bf16[128,128], index: 3, kind: input, shape index: {}]   ;;  %s626_s4 = inlined_call_operand.vmem [shape: f32[1,128], index: 4, kind: input, shape index: {}]   ;;  %s627_s5 = inlined_call_operand.hbm [shape: bf16[128,128], index: 5, kind: input, shape index: {}]   ;;  %s628_s6 = inlined_call_operand.vmem [shape: f32[1,128], index: 6, kind: input, shape index: {}]   ;;  %s629_s7 = inlined_call_operand.hbm [shape: f32[16,128], index: 7, kind: output, shape index: {}]  }
   0x1   :  { %13 = vsyncpa [#allocation6], 0 }
   0x2   :  { %14 = vsyncpa [#allocation9], 0  ;;  %s33_s26 = sshll.u32 %s623_s1, 4  ;;  %s34_s26 = int_to_ptr.hbm [resolvable:$true] %s33_s26 }
   0x3   :  { %15 = vsyncpa [#allocation4], 0  ;;  %s543_s27 = smov [#allocation5]   ;;  %s20_s8 = sshll.u32 %s622_s0, 4  ;;  %s21_s8 = int_to_ptr.hbm [resolvable:$true] %s20_s8 }
   0x4   :  { %s35_s28 = sshll.u32 %s543_s27, 4  ;;  %s544_s9 = smov 64   ;;  %s36_s28 = int_to_ptr.vmem [resolvable:$true] %s35_s28 }
   0x5   :  { %s545_s10 = smov 4   ;;  %s546_s11 = smov [#allocation2]  }
   0x6   :  { %41 = dma.hbm_to_vmem [thread:$0]  %s34_s26, 128, %s36_s28, [#allocation6], %s544_s9, %s544_s9, %s545_s10  }
   0x7   :  { %s22_s12 = sshll.u32 %s546_s11, 4  ;;  %s547_s13 = smov 128   ;;  %s23_s12 = int_to_ptr.vmem [resolvable:$true] %s22_s12 }
   0x8   :  { %s548_s14 = smov 8   ;;  %s48_s16 = sshll.u32 %s625_s3, 4  ;;  %s49_s16 = int_to_ptr.hbm [resolvable:$true] %s48_s16 }
   0x9   :  { %28 = dma.hbm_to_vmem [thread:$0]  %s21_s8, 256, %s23_s12, [#allocation3], %s547_s13, %s547_s13, %s548_s14  }
   0xa   :  { %s549_s17 = smov [#allocation7]   ;;  %s63_s20 = sshll.u32 %s627_s5, 4  ;;  %s64_s20 = int_to_ptr.hbm [resolvable:$true] %s63_s20 }
   0xb   :  { %s50_s0 = sshll.u32 %s549_s17, 4  ;;  %s550_s21 = smov [#allocation8]   ;;  %s51_s0 = int_to_ptr.vmem [resolvable:$true] %s50_s0 }
   0xc   :  { %56 = dma.hbm_to_vmem [thread:$0]  %s49_s16, 1024, %s51_s0, [#allocation6], %s544_s9, %s544_s9, %s545_s10  }
   0xd   :  { %s65_s22 = sshll.u32 %s550_s21, 4  ;;  %s66_s22 = int_to_ptr.vmem [resolvable:$true] %s65_s22 }
   0xe   :  { %71 = dma.hbm_to_vmem [thread:$0]  %s64_s20, 1024, %s66_s22, [#allocation9], %s544_s9, %s544_s9, %s545_s10  }
   0xf   :  { %535 = dma.done.wait [#allocation3], 256  }
  0x10   :  { %536 = vsyncadd [#allocation3], 4294967040 }
  0x11   :  { %537 = dma.done.wait [#allocation6], 1152  }
  0x12   :  { %538 = vsyncadd [#allocation6], 4294966144 }
  0x13   :  { %539 = dma.done.wait [#allocation9], 1024  }
  0x14   :  { %540 = vsyncadd [#allocation9], 4294966272  ;;  %v386_v0 = vld [vmem:[#allocation5] sm:$0xff]  ;;  %v91_v1 = vld [vmem:[#allocation2] sm:$0xff]  ;;  %vm106_vm0 = vcmask 130048   ;;  %s551_s26 = smov [#allocation10]  }
  0x15   :  { %v92_v2 = vld [vmem:[#allocation2 + $0x8] sm:$0xff]  ;;  %v394_v4 = vld [vmem:[#allocation7 + $0x38] sm:$0xff]  ;;  %117 = vmatpush.bf16.msra.mxu0 %v386_v0  ;;  %v392_v6 = vld [vmem:[#allocation7 + $0x28] sm:$0xff]  ;;  %s300_s27 = sshll.u32 %s551_s26, 4  ;;  %s301_s27 = int_to_ptr.vmem [resolvable:$true] %s300_s27 }
  0x16   :  { %v93_v3 = vpack.c.bf16 %v92_v2, %v91_v1  ;;  %195 = vmatpush.bf16.msra.mxu1 %v394_v4  ;;  %v393_v5 = vld [vmem:[#allocation7 + $0x30] sm:$0xff]  ;;  %v391_v7 = vld [vmem:[#allocation7 + $0x20] sm:$0xff]  ;;  %v390_v8 = vld [vmem:[#allocation7 + $0x18] sm:$0xff] }
  0x17   :  { %v389_v9 = vld [vmem:[#allocation7 + $0x10] sm:$0xff]  ;;  %v388_v10 = vld [vmem:[#allocation7 + $0x8] sm:$0xff]  ;;  %v387_v11 = vld [vmem:[#allocation7] sm:$0xff] }
  0x18   :  { %321 = vmatmul.msk.bf16.vlgmr.msra.gmra.mxu0 %vm106_vm0, %v93_v3  ;;  %v402_v12 = vld [vmem:[#allocation8 + $0x38] sm:$0xff]  ;;  %v401_v13 = vld [vmem:[#allocation8 + $0x30] sm:$0xff]  ;;  %v400_v14 = vld [vmem:[#allocation8 + $0x28] sm:$0xff] }
  0x19   :  { %280 = vmatpush.bf16.msra.mxu2 %v402_v12  ;;  %v399_v15 = vld [vmem:[#allocation8 + $0x20] sm:$0xff]  ;;  %v412_v17 = vld [vmem:[%s624_s2] ss:$0 sm:$0xff]  ;;  %v398_v24 = vld [vmem:[#allocation8 + $0x18] sm:$0xff] }
  0x1a   :  { %196 = vmatpush.bf16.msra.mxu1 %v393_v5  ;;  %v397_v25 = vld [vmem:[#allocation8 + $0x10] sm:$0xff]  ;;  %v396_v26 = vld [vmem:[#allocation8 + $0x8] sm:$0xff]  ;;  %v395_v27 = vld [vmem:[#allocation8] sm:$0xff] }
  0x1b   :  { %v413_v29 = vld [vmem:[%s626_s4] ss:$0 sm:$0xff]  ;;  %s302_s4 = sshll.u32 %s629_s7, 4  ;;  %s303_s4 = int_to_ptr.hbm [resolvable:$true] %s302_s4 }
  0x1c   :  { %v414_v36 = vld [vmem:[%s628_s6] ss:$0 sm:$0xff] }
  0x1d   :  { %281 = vmatpush.bf16.msra.mxu2 %v401_v13 }
  0x1e   :  { %197 = vmatpush.bf16.msra.mxu1 %v392_v6 }
  0x21   :  { %282 = vmatpush.bf16.msra.mxu2 %v400_v14 }
  0x22   :  { %198 = vmatpush.bf16.msra.mxu1 %v391_v7 }
  0x25   :  { %283 = vmatpush.bf16.msra.mxu2 %v399_v15 }
  0x26   :  { %199 = vmatpush.bf16.msra.mxu1 %v390_v8 }
  0x29   :  { %284 = vmatpush.bf16.msra.mxu2 %v398_v24 }
  0x2a   :  { %200 = vmatpush.bf16.msra.mxu1 %v389_v9 }
  0x2d   :  { %285 = vmatpush.bf16.msra.mxu2 %v397_v25 }
  0x2e   :  { %201 = vmatpush.bf16.msra.mxu1 %v388_v10 }
  0x31   :  { %286 = vmatpush.bf16.msra.mxu2 %v396_v26 }
  0x32   :  { %202 = vmatpush.bf16.msra.mxu1 %v387_v11 }
  0x35   :  { %287 = vmatpush.bf16.msra.mxu2 %v395_v27 }
  0x95   :  { %v119_v16 = vpop.f32.mrf.mxu0 }
  0x96   :  { %v120_v18 = vadd.f32 %v412_v17, %v119_v16 }
  0x98   :  { %v124_v21 = vmax.f32 %v120_v18, 0.0 }
  0x9d   :  { %v121_v19 = vpop.f32.mrf.mxu0 }
  0x9e   :  { %v122_v20 = vadd.f32 %v412_v17, %v121_v19 }
  0xa0   :  { %v125_v22 = vmax.f32 %v122_v20, 0.0 }
  0xa2   :  { %v126_v23 = vpack.c.bf16 %v125_v22, %v124_v21 }
  0xa4   :  { %203 = vmatmul.bf16.vlgmr.msra.gmra.mxu1 %v126_v23 }
 0x121   :  { %v204_v28 = vpop.f32.mrf.mxu1 }
 0x122   :  { %v205_v30 = vadd.f32 %v413_v29, %v204_v28 }
 0x124   :  { %v209_v33 = vmax.f32 %v205_v30, 0.0 }
 0x129   :  { %v206_v31 = vpop.f32.mrf.mxu1 }
 0x12a   :  { %v207_v32 = vadd.f32 %v413_v29, %v206_v31 }
 0x12c   :  { %v210_v34 = vmax.f32 %v207_v32, 0.0 }
 0x12e   :  { %v211_v35 = vpack.c.bf16 %v210_v34, %v209_v33 }
 0x130   :  { %288 = vmatmul.bf16.vlgmr.msra.gmra.mxu2 %v211_v35 }
 0x1b3   :  { %v289_v37 = vpop.f32.mrf.mxu2 }
 0x1b4   :  { %v290_v38 = vadd.f32 %v414_v36, %v289_v37 }
 0x1b6   :  { %294 = vst [vmem:[#allocation10] sm:$0xff] %v290_v38 }
 0x1bb   :  { %v291_v39 = vpop.f32.mrf.mxu2 }
 0x1bc   :  { %v292_v40 = vadd.f32 %v414_v36, %v291_v39 }
 0x1be   :  { %295 = vst [vmem:[#allocation10 + $0x8] sm:$0xff] %v292_v40 }
 0x1bf   :  { %308 = dma.vmem_to_hbm [thread:$0]  %s301_s27, 256, %s303_s4, [#allocation4], %s547_s13, %s547_s13, %s548_s14  }
 0x1c0   :  { %541 = dma.done.wait [#allocation4], 256  }
 0x1c1   :  { %542 = vsyncadd [#allocation4], 4294967040 }
 0x1c2   :  { %313 = vsyncpa [#allocation3], 1 }
 0x1c3   :  { %314 = vsyncpa [#allocation6], 1 }
 0x1c4   :  { %315 = vsyncpa [#allocation9], 1 }
 0x1c5   :  { %316 = vsyncpa [#allocation4], 1 }

</bundles_post_ra>
